<compile_context>
chip_gen: v5e
topology: v5e:2x2
jax: 0.10.0
libtpu: 0.0.40
codegen_flags: <defaults>
</compile_context>

<pallas_src>
import jax
import jax.numpy as jnp
from jax.experimental import pallas as pl
from jax.experimental.pallas import tpu as pltpu

_LANES = 128
_WIDE_LANES = 1024            # wide lane slab when the tensor is large enough
_TARGET_BLOCK_BYTES = 1 << 20  # ~1 MiB per block (x2 arrays x2 buffers ~ 4 MiB VMEM)


def _add_one_kernel(x_ref, o_ref):
    # Elementwise "input + 1" — the entire forward pass of Model.
    o_ref[...] = x_ref[...] + jnp.asarray(1, dtype=x_ref.dtype)


def _sublane_multiple(dtype):
    # Min second-minor tile: 8 for 4-byte, 16 for 2-byte, 32 for 1-byte dtypes.
    itemsize = jnp.dtype(dtype).itemsize
    return max(8, 32 // max(itemsize, 1))


def model_forward(x):
    """Pallas equivalent of Model.forward: returns x + 1 (same shape/dtype)."""
    orig_shape = x.shape
    n = x.size
    dtype = x.dtype
    itemsize = jnp.dtype(dtype).itemsize
    sub = _sublane_multiple(dtype)

    # ---- choose a lane-dense 2-D view --------------------------------------
    # Prefer a wide lane dimension (>=1024) for big tensors; fall back to 128
    # lanes for small ones so padding stays tiny.
    cols = _WIDE_LANES if n >= _WIDE_LANES * sub else _LANES
    rows_unpadded = pl.cdiv(n, cols)
    rows = ((rows_unpadded + sub - 1) // sub) * sub  # sublane-aligned rows
    padded = rows * cols

    xf = x.reshape(-1)
    if padded != n:
        xf = jnp.pad(xf, (0, padded - n))
    x2d = xf.reshape(rows, cols)

    # ---- pick a tile: ~1 MiB blocks, rows a multiple of the sublane tile ----
    tile_rows = _TARGET_BLOCK_BYTES // (cols * itemsize)
    tile_rows = (tile_rows // sub) * sub
    tile_rows = max(sub, min(rows, tile_rows))

    grid = (pl.cdiv(rows, tile_rows),)

    out2d = pl.pallas_call(
        _add_one_kernel,
        out_shape=jax.ShapeDtypeStruct((rows, cols), dtype),
        grid=grid,
        in_specs=[pl.BlockSpec((tile_rows, cols), lambda i: (i, 0))],
        out_specs=pl.BlockSpec((tile_rows, cols), lambda i: (i, 0)),
        compiler_params=pltpu.CompilerParams(
            dimension_semantics=("parallel",)
        ),
    )(x2d)

    out_flat = out2d.reshape(-1)
    if padded != n:
        out_flat = out_flat[:n]
    return out_flat.reshape(orig_shape)


if __name__ == "__main__":
    key = jax.random.PRNGKey(0)
    # Small NCHW input consistent with a conv-style module skeleton.
    x = jax.random.normal(key, (2, 4, 16, 16), dtype=jnp.float32)

    y = model_forward(x)
    jax.block_until_ready(y)

    # Correctness check against the trivial reference (x + 1).
    ref = x + 1.0
    assert y.shape == x.shape and y.dtype == x.dtype
    assert jnp.allclose(y, ref, atol=0.0, rtol=0.0)

    print("KERNEL_OK")
</pallas_src>

<mosaic_0001>
module attributes {stable_mosaic.version = 11 : i64} {
  func.func @_add_one_kernel(%arg0: i32, %arg1: memref<16x128xf32, #tpu.memory_space<vmem>>, %arg2: memref<16x128xf32, #tpu.memory_space<vmem>>) attributes {dimension_semantics = [#tpu.dimension_semantics<parallel>], iteration_bounds = array<i64: 1>, scalar_prefetch = 0 : i64, scratch_operands = 0 : i64, tpu.core_type = #tpu.core_type<tc>, window_params = [{transform_indices = @transform_0, window_bounds = array<i64: 16, 128>}, {transform_indices = @transform_1, window_bounds = array<i64: 16, 128>}]} {
    %c0 = arith.constant 0 : index
    %c0_0 = arith.constant 0 : index
    %0 = vector.load %arg1[%c0, %c0_0] : memref<16x128xf32, #tpu.memory_space<vmem>>, vector<16x128xf32>
    %cst = arith.constant 1.000000e+00 : f32
    %1 = vector.broadcast %cst : f32 to vector<16x128xf32>
    %2 = arith.addf %0, %1 : vector<16x128xf32>
    %c0_1 = arith.constant 0 : index
    %c0_2 = arith.constant 0 : index
    %3 = vector.load %arg2[%c0_1, %c0_2] : memref<16x128xf32, #tpu.memory_space<vmem>>, vector<16x128xf32>
    tpu.vector_store %arg2[%c0_1, %c0_2], %2 {strides = array<i32>} : memref<16x128xf32, #tpu.memory_space<vmem>>, vector<16x128xf32>,
    return
  }
  func.func @transform_0(%arg0: i32) -> (i32, i32) {
    %c0_i32 = arith.constant 0 : i32
    %c0_i32_0 = arith.constant 0 : i32
    return %arg0, %c0_i32 : i32, i32
  }
  func.func @transform_1(%arg0: i32) -> (i32, i32) {
    %c0_i32 = arith.constant 0 : i32
    %c0_i32_0 = arith.constant 0 : i32
    return %arg0, %c0_i32 : i32, i32
  }
}

</mosaic_0001>

<bundles_post_ra>
// kernel: tpu_custom_call.1
= control target key start
LH: loop header
LB: loop body
LE: loop exit
PB: predicated region body
PF: predicated region fallthrough
CT: control target
= control target key end

     0   :  { %6 = vsyncpa [#allocation3], 0  ;;  %s126_s0 = inlined_call_operand.hbm [shape: f32[16,128], index: 0, kind: input, shape index: {}]   ;;  %s127_s1 = inlined_call_operand.hbm [shape: f32[16,128], index: 1, kind: output, shape index: {}]  }
   0x1   :  { %7 = vsyncpa [#allocation4], 0  ;;  %s12_s8 = sshll.u32 %s126_s0, 4  ;;  %s106_s9 = smov [#allocation2]   ;;  %s13_s8 = int_to_ptr.hbm [resolvable:$true] %s12_s8 }
   0x2   :  { %s14_s10 = sshll.u32 %s106_s9, 4  ;;  %s107_s11 = smov 128   ;;  %s15_s10 = int_to_ptr.vmem [resolvable:$true] %s14_s10 }
   0x3   :  { %s108_s12 = smov 8  }
   0x4   :  { %20 = dma.hbm_to_vmem [thread:$0]  %s13_s8, 256, %s15_s10, [#allocation3], %s107_s11, %s107_s11, %s108_s12  }
   0x5   :  { %102 = dma.done.wait [#allocation3], 256  }
   0x6   :  { %103 = vsyncadd [#allocation3], 4294967040  ;;  %s109_s13 = smov [#allocation5]   ;;  %s37_s17 = sshll.u32 %s127_s1, 4  ;;  %v25_v0 = vld [vmem:[#allocation2] sm:$0xff]  ;;  %v26_v1 = vld [vmem:[#allocation2 + $0x8] sm:$0xff]  ;;  %s38_s17 = int_to_ptr.hbm [resolvable:$true] %s37_s17 }
   0x7   :  { %s35_s14 = sshll.u32 %s109_s13, 4  ;;  %v27_v2 = vadd.f32 1.0, %v25_v0  ;;  %v28_v3 = vadd.f32 1.0, %v26_v1  ;;  %s36_s14 = int_to_ptr.vmem [resolvable:$true] %s35_s14 }
   0x9   :  { %29 = vst [vmem:[#allocation5] sm:$0xff] %v27_v2 }
   0xa   :  { %30 = vst [vmem:[#allocation5 + $0x8] sm:$0xff] %v28_v3 }
   0xb   :  { %43 = dma.vmem_to_hbm [thread:$0]  %s36_s14, 256, %s38_s17, [#allocation4], %s107_s11, %s107_s11, %s108_s12  }
   0xc   :  { %104 = dma.done.wait [#allocation4], 256  }
   0xd   :  { %105 = vsyncadd [#allocation4], 4294967040 }
   0xe   :  { %48 = vsyncpa [#allocation3], 1 }
   0xf   :  { %49 = vsyncpa [#allocation4], 1 }

</bundles_post_ra>
